<compile_context>
chip_gen: v5e
topology: v5e:2x2
jax: 0.10.0
libtpu: 0.0.40
codegen_flags: <defaults>
</compile_context>

<pallas_src>
import math

import jax
import jax.numpy as jnp
from jax.experimental import pallas as pl
from jax.experimental.pallas import tpu as pltpu


# ---------------------------------------------------------------------------
# Generation-aware tuning, computed once at import time.
# ---------------------------------------------------------------------------
def _vmem_capacity_bytes():
    try:
        info = pltpu.get_tpu_info()
        cap = getattr(info, "vmem_capacity_bytes", None)
        if cap:
            return int(cap)
    except Exception:
        pass
    return 64 * 1024 * 1024  # conservative (v7x-sized) default


def _device_kind():
    try:
        return jax.devices()[0].device_kind.lower()
    except Exception:
        return ""


_VMEM_CAPACITY = _vmem_capacity_bytes()
# Explicit scoped-VMEM budget: half of physical VMEM (64 MiB on v5e/v6e with
# 128 MiB physical, 32 MiB on v7x with 64 MiB/TC).  This raises v5e's 16 MiB
# scoped default so the blocks below always fit.
_VMEM_LIMIT_BYTES = min(_VMEM_CAPACITY // 2, 64 * 1024 * 1024)
# Per-block budget: input + output, each double-buffered => 4x block must fit
# inside the limit with headroom for Mosaic's internal scratch.
#   limit/8 -> 8 MiB blocks on v5e/v6e, 4 MiB on v7x.
_TARGET_BLOCK_BYTES = _VMEM_LIMIT_BYTES // 8

# v7x has 2 TensorCores per chip; only CORE_PARALLEL reliably shards a grid
# axis across them.  Keep plain "parallel" on single-TC v5e/v6e.
_CORE_PARALLEL = getattr(pltpu, "CORE_PARALLEL", None)
_USE_CORE_PARALLEL = ("7" in _device_kind()) and (_CORE_PARALLEL is not None)

_LANE_CAP = 32768  # max lane width considered for the flat re-view


# ---------------------------------------------------------------------------
# Kernel
# ---------------------------------------------------------------------------
def _elu_feature_map_kernel(x_ref, o_ref):
    # Widen per-vreg (free on VPU/EUP); elu(x) + 1 == where(x > 0, x + 1, exp(x)).
    # Clamp the exp argument so the untaken branch never overflows.
    xf = x_ref[...].astype(jnp.float32)
    out = jnp.where(xf > 0, xf + 1.0, jnp.exp(jnp.minimum(xf, 0.0)))
    o_ref[...] = out.astype(o_ref.dtype)


# ---------------------------------------------------------------------------
# Shape / tiling helpers (all trace-time Python)
# ---------------------------------------------------------------------------
def _sublane_multiple(dtype):
    itemsize = jnp.dtype(dtype).itemsize
    # 8 for 4-byte, 16 for 2-byte, 32 for 1-byte dtypes (sublane packing).
    return max(8, 32 // max(itemsize, 1))


def _round_up(n, m):
    return ((n + m - 1) // m) * m


def _pick_lane_cols(total):
    """Largest multiple-of-128 divisor of `total` (lane-dense flat re-view),
    preferring widths that still leave a healthy number of rows.  Returns None
    if no multiple-of-128 factorisation exists."""
    best_any = best_rows8 = best_rows64 = 0
    cap = min(total, _LANE_CAP)
    c = 128
    while c <= cap:
        if total % c == 0:
            rows = total // c
            best_any = c
            if rows >= 8:
                best_rows8 = c
            if rows >= 64:
                best_rows64 = c
        c += 128
    return best_rows64 or best_rows8 or best_any or None


# ---------------------------------------------------------------------------
# Jitted dispatch: phi(x) = elu(x) + 1
# ---------------------------------------------------------------------------
@jax.jit
def _elu_feature_map(x):
    orig_shape = x.shape
    dtype = x.dtype
    total = math.prod(orig_shape)
    itemsize = jnp.dtype(dtype).itemsize

    cols = _pick_lane_cols(total)
    if cols is None:
        # No multiple-of-128 factorisation of the element count: a narrow-lane
        # Pallas block would pay ~4x masked-store / lane-padding overhead, so
        # let XLA's fused elementwise (full lanes, HBM roofline) handle it.
        xf = x.astype(jnp.float32)
        return jnp.where(xf > 0, xf + 1.0,
                         jnp.exp(jnp.minimum(xf, 0.0))).astype(dtype)

    rows = total // cols
    sub = _sublane_multiple(dtype)

    block_rows = _TARGET_BLOCK_BYTES // (cols * itemsize)
    block_rows = max(sub, (block_rows // sub) * sub)
    if _USE_CORE_PARALLEL:
        # Keep >= 4 grid steps so both v7x TensorCores get balanced work.
        block_rows = min(block_rows, max(sub, _round_up(pl.cdiv(rows, 4), sub)))
    block_rows = min(block_rows, rows)  # == rows (full dim) is always legal

    grid = (pl.cdiv(rows, block_rows),)  # ragged last block masked by Pallas
    row_sem = _CORE_PARALLEL if _USE_CORE_PARALLEL else "parallel"

    x2 = x.reshape(rows, cols)  # contiguous reshape: free layout bitcast

    out = pl.pallas_call(
        _elu_feature_map_kernel,
        out_shape=jax.ShapeDtypeStruct((rows, cols), dtype),
        grid_spec=pltpu.PrefetchScalarGridSpec(
            num_scalar_prefetch=0,
            grid=grid,
            in_specs=[pl.BlockSpec((block_rows, cols), lambda i: (i, 0))],
            out_specs=pl.BlockSpec((block_rows, cols), lambda i: (i, 0)),
        ),
        compiler_params=pltpu.CompilerParams(
            dimension_semantics=(row_sem,),
            vmem_limit_bytes=_VMEM_LIMIT_BYTES,
        ),
        cost_estimate=pl.CostEstimate(
            flops=total,
            transcendentals=total,
            bytes_accessed=2 * total * itemsize,
        ),
    )(x2)

    return out.reshape(orig_shape)


# ---------------------------------------------------------------------------
# Module-level wrapper mirroring the PyTorch FeatureMap interface
# ---------------------------------------------------------------------------
class FeatureMap:
    """JAX/Pallas analogue of the PyTorch FeatureMap (elu(x)+1 feature map)."""

    def __init__(self, query_dims):
        self.query_dims = query_dims

    @classmethod
    def factory(cls, *args, **kwargs):
        def inner(query_dims):
            return cls(query_dims, *args, **kwargs)
        return inner

    def new_feature_map(self, device=None):
        # The elu feature map has no random parameters to (re)sample.
        return None

    def __call__(self, x):
        return self.forward(x)

    def forward_queries(self, x):
        return self.forward(x)

    def forward_keys(self, x):
        return self.forward(x)

    def forward(self, x):
        assert x.shape[-1] == self.query_dims, "last dim must equal query_dims"
        # _elu_feature_map is jitted: reshape + pallas_call + reshape run as a
        # single compiled call (no per-call eager dispatch).
        return _elu_feature_map(x)


def _reference_elu_feature_map(x):
    xf = x.astype(jnp.float32)
    return jnp.where(xf > 0, xf + 1.0, jnp.exp(jnp.minimum(xf, 0.0)))


if __name__ == "__main__":
    key = jax.random.PRNGKey(0)
    k0, k1, k2 = jax.random.split(key, 3)

    # Main case: (N, L, H, E) with total divisible by 128 -> lane-dense path.
    N, L, H, E = 2, 8, 4, 32
    x = jax.random.normal(k0, (N, L, H, E), dtype=jnp.float32)

    fm = FeatureMap(query_dims=E)
    fm.new_feature_map(device=None)

    q_feat = fm.forward_queries(x)
    k_feat = fm.forward_keys(x)
    jax.block_until_ready(q_feat)
    jax.block_until_ready(k_feat)

    ref = _reference_elu_feature_map(x)
    assert q_feat.shape == x.shape and q_feat.dtype == x.dtype
    assert jnp.allclose(q_feat, ref, atol=1e-5, rtol=1e-5)
    assert jnp.allclose(k_feat, ref, atol=1e-5, rtol=1e-5)

    # Native bf16 I/O (no wrapper upcast): compute in f32 per-vreg in kernel.
    x_bf = jax.random.normal(k1, (N, L, H, E), dtype=jnp.bfloat16)
    out_bf = fm(x_bf)
    jax.block_until_ready(out_bf)
    assert out_bf.dtype == jnp.bfloat16 and out_bf.shape == x_bf.shape
    ref_bf = _reference_elu_feature_map(x_bf).astype(jnp.bfloat16)
    assert jnp.allclose(out_bf.astype(jnp.float32),
                        ref_bf.astype(jnp.float32), atol=2e-2, rtol=2e-2)

    # Odd element count (960, no multiple-of-128 factorisation): dispatches to
    # the fused-XLA elementwise fallback inside the same jitted function.
    x_odd = jax.random.normal(k2, (3, 5, 2, E), dtype=jnp.float32)
    out_odd = fm(x_odd)
    jax.block_until_ready(out_odd)
    assert jnp.allclose(out_odd, _reference_elu_feature_map(x_odd),
                        atol=1e-5, rtol=1e-5)

    print("KERNEL_OK")
</pallas_src>

<mosaic_0001>
module attributes {stable_mosaic.version = 11 : i64} {
  func.func @_elu_feature_map_kernel(%arg0: i32, %arg1: memref<8x256xf32, #tpu.memory_space<vmem>>, %arg2: memref<8x256xf32, #tpu.memory_space<vmem>>) attributes {dimension_semantics = [#tpu.dimension_semantics<parallel>], iteration_bounds = array<i64: 1>, scalar_prefetch = 0 : i64, scratch_operands = 0 : i64, tpu.core_type = #tpu.core_type<tc>, window_params = [{transform_indices = @transform_0, window_bounds = array<i64: 8, 256>}, {transform_indices = @transform_1, window_bounds = array<i64: 8, 256>}]} {
    %c0 = arith.constant 0 : index
    %c0_0 = arith.constant 0 : index
    %0 = vector.load %arg1[%c0, %c0_0] : memref<8x256xf32, #tpu.memory_space<vmem>>, vector<8x256xf32>
    %cst = arith.constant 0.000000e+00 : f32
    %1 = vector.broadcast %cst : f32 to vector<8x256xf32>
    %2 = arith.cmpf ogt, %0, %1 : vector<8x256xf32>
    %cst_1 = arith.constant 1.000000e+00 : f32
    %3 = vector.broadcast %cst_1 : f32 to vector<8x256xf32>
    %4 = arith.addf %0, %3 : vector<8x256xf32>
    %cst_2 = arith.constant 0.000000e+00 : f32
    %5 = vector.broadcast %cst_2 : f32 to vector<8x256xf32>
    %6 = arith.minimumf %0, %5 : vector<8x256xf32>
    %7 = math.exp %6 : vector<8x256xf32>
    %8 = arith.select %2, %4, %7 : vector<8x256xi1>, vector<8x256xf32>
    %c0_3 = arith.constant 0 : index
    %c0_4 = arith.constant 0 : index
    %9 = vector.load %arg2[%c0_3, %c0_4] : memref<8x256xf32, #tpu.memory_space<vmem>>, vector<8x256xf32>
    tpu.vector_store %arg2[%c0_3, %c0_4], %8 {strides = array<i32>} : memref<8x256xf32, #tpu.memory_space<vmem>>, vector<8x256xf32>,
    return
  }
  func.func @transform_0(%arg0: i32) -> (i32, i32) {
    %c0_i32 = arith.constant 0 : i32
    %c0_i32_0 = arith.constant 0 : i32
    return %arg0, %c0_i32 : i32, i32
  }
  func.func @transform_1(%arg0: i32) -> (i32, i32) {
    %c0_i32 = arith.constant 0 : i32
    %c0_i32_0 = arith.constant 0 : i32
    return %arg0, %c0_i32 : i32, i32
  }
}

</mosaic_0001>

<bundles_post_ra>
// kernel: _elu_feature_map.1
= control target key start
LH: loop header
LB: loop body
LE: loop exit
PB: predicated region body
PF: predicated region fallthrough
CT: control target
= control target key end

     0   :  { %s54_s0 = inlined_call_operand.vmem [shape: f32[8,256], index: 0, kind: input, shape index: {}]   ;;  %s55_s1 = inlined_call_operand.vmem [shape: f32[8,256], index: 1, kind: output, shape index: {}]  }
   0x1   :  { %v8_v0 = vld [vmem:[%s54_s0] sm:$0xff]  ;;  %v9_v1 = vld [vmem:[%s54_s0 + $0x8] sm:$0xff] }
   0x2   :  { %v14_v2 = vmin.f32 %v8_v0, 0.0  ;;  %v15_v3 = vmin.f32 %v9_v1, 0.0  ;;  %v12_v6 = vadd.f32 1.0, %v8_v0  ;;  %vm10_vm0 = vcmp.gt.f32.partialorder %v8_v0, 0.0 }
   0x3   :  { %v13_v7 = vadd.f32 1.0, %v9_v1  ;;  %vm11_vm1 = vcmp.gt.f32.partialorder %v9_v1, 0.0 }
   0x4   :  { %v16_v4 = vmul.f32 1.442695, %v14_v2  ;;  %v18_v5 = vmul.f32 1.442695, %v15_v3 }
   0x6   :  { %28 = vpow2.f32 %v16_v4 }
   0x7   :  { %30 = vpow2.f32 %v18_v5 }
   0xc   :  { %v29_v8 = vpop.eup %28 }
   0xd   :  { %v31_v9 = vpop.eup %30  ;;  %v20_v10 = vsel %vm10_vm0, %v12_v6, %v29_v8 }
   0xe   :  { %22 = vst [vmem:[%s55_s1] sm:$0xff] %v20_v10  ;;  %v21_v11 = vsel %vm11_vm1, %v13_v7, %v31_v9 }
   0xf   :  { %23 = vst [vmem:[%s55_s1 + $0x8] sm:$0xff] %v21_v11 }

</bundles_post_ra>
